<compile_context>
chip_gen: v7x
topology: tpu7x:2x2x1
jax: 0.10.0
libtpu: 0.0.40
codegen_flags: <defaults>
</compile_context>

<pallas_src>
import jax
import jax.numpy as jnp
from jax.experimental import pallas as pl
from jax.experimental.pallas import tpu as pltpu


_SMALL_C = 32  # threshold for the fully-unrolled per-channel scalar MAC path


def _sse_kernel_small_c(x_ref, w_ref, b_ref, o_ref):
    # x_ref: (1, C, TN) VMEM; w_ref: (C,) SMEM; b_ref: (1,) SMEM; o_ref: (1, 1, TN)
    x = x_ref[0]                                              # (C, TN)
    acc = jnp.full((1, x.shape[-1]), b_ref[0], jnp.float32)
    for c in range(x.shape[0]):                               # static C, fully unrolled
        acc = acc + w_ref[c] * x[c:c + 1, :].astype(jnp.float32)
    o_ref[0] = jax.nn.sigmoid(acc).astype(o_ref.dtype)        # sigmoid -> EUP slot


def _sse_kernel_large_c(x_ref, w_ref, b_ref, o_ref):
    # x_ref: (1, C, TN) VMEM; w_ref: (1, C) VMEM (resident); b_ref: (1,) SMEM
    x = x_ref[0]                                              # (C, TN)
    y = jnp.dot(w_ref[...], x, preferred_element_type=jnp.float32)  # (1, TN)
    o_ref[0] = jax.nn.sigmoid(y + b_ref[0]).astype(o_ref.dtype)


def _round_up(a, b):
    return -(-a // b) * b


def _choose_tile_n(hw, c, itemsize, *, max_tile_n=4096, block_budget_bytes=4 << 20):
    """Largest lane tile (multiple of 128) keeping the double-buffered input
    block well inside the scoped-VMEM default on v5e/v6e/v7x, while minimizing
    pad overhead for the given pixel count."""
    by_budget = max(128, (block_budget_bytes // max(1, c * itemsize)) // 128 * 128)
    tmax = min(max_tile_n, by_budget)
    hw128 = _round_up(hw, 128)
    if hw128 <= tmax:
        return hw128
    n_tiles = -(-hw // tmax)
    return _round_up(-(-hw // n_tiles), 128)


def sse_forward(x_nchw, w_folded, b_folded):
    """x_nchw: (N, C, H, W) any float dtype; w_folded: (C,) f32; b_folded: (1,) f32."""
    N, C, H, W = x_nchw.shape
    hw = H * W
    itemsize = jnp.dtype(x_nchw.dtype).itemsize
    tn = _choose_tile_n(hw, C, itemsize)
    hw_pad = _round_up(hw, tn)

    x3 = x_nchw.reshape(N, C, hw)                 # free view, native NCHW order
    if hw_pad != hw:                              # pad tail instead of asserting
        x3 = jnp.pad(x3, ((0, 0), (0, 0), (0, hw_pad - hw)))

    grid = (N, hw_pad // tn)
    x_spec = pl.BlockSpec((1, C, tn), lambda n, j: (n, 0, j))
    o_spec = pl.BlockSpec((1, 1, tn), lambda n, j: (n, 0, j))

    if C <= _SMALL_C:
        kernel = _sse_kernel_small_c
        w_arg = w_folded.reshape(C).astype(jnp.float32)
        w_spec = pl.BlockSpec(memory_space=pltpu.SMEM)       # scalar weights in SMEM
    else:
        kernel = _sse_kernel_large_c
        w_arg = w_folded.reshape(1, C).astype(jnp.float32)
        w_spec = pl.BlockSpec((1, C), lambda n, j: (0, 0))   # resident VMEM row

    out = pl.pallas_call(
        kernel,
        out_shape=jax.ShapeDtypeStruct((N, 1, hw_pad), x_nchw.dtype),
        grid_spec=pltpu.PrefetchScalarGridSpec(
            num_scalar_prefetch=0,
            grid=grid,
            in_specs=[
                x_spec,
                w_spec,
                pl.BlockSpec(memory_space=pltpu.SMEM),       # scalar bias
            ],
            out_specs=o_spec,
        ),
        compiler_params=pltpu.CompilerParams(
            dimension_semantics=("parallel", "parallel")),   # shards across v7x's 2 TCs
    )(x3, w_arg, b_folded.reshape(1).astype(jnp.float32))

    # (N, 1, hw_pad) -> drop pad -> (N, 1, H, W): reshape is free, no transpose
    return out[:, :, :hw].reshape(N, 1, H, W)


def make_params(out_channels, key):
    """Deterministic synthetic parameters for CB(out_channels, 1), BN folded."""
    fan_in = out_channels  # 1x1 conv
    bound = 1.0 / (fan_in ** 0.5)
    # Conv2d(out_channels, 1, kernel_size=1, bias=False) weight: (1, C, 1, 1)
    conv_w = jax.random.uniform(key, (1, out_channels, 1, 1),
                                jnp.float32, -bound, bound)
    # BatchNorm2d(1) eval-mode defaults: gamma=1, beta=0, running mean=0, var=1
    # TODO(synk): training-mode BN (batch statistics) is not reproduced here;
    #             eval-mode BN with running stats is folded instead.
    gamma, beta, run_mean, run_var, eps = 1.0, 0.0, 0.0, 1.0, 1e-5
    bn_scale = gamma / jnp.sqrt(run_var + eps)
    w_folded = (conv_w.reshape(out_channels) * bn_scale).astype(jnp.float32)  # (C,)
    b_folded = jnp.array([beta - run_mean * bn_scale], dtype=jnp.float32)     # (1,)
    return w_folded, b_folded


if __name__ == "__main__":
    key = jax.random.PRNGKey(0)
    k_x, k_p = jax.random.split(key)

    N, C, H, W = 2, 4, 16, 16  # NCHW, C == out_channels of sSE
    x = jax.random.normal(k_x, (N, C, H, W), dtype=jnp.float32)
    w_folded, b_folded = make_params(C, k_p)

    out = jax.block_until_ready(sse_forward(x, w_folded, b_folded))

    # Pure-JAX reference (1x1 conv with folded BN + sigmoid)
    ref = jax.nn.sigmoid(
        jnp.einsum("nchw,c->nhw", x, w_folded) + b_folded[0])[:, None]
    assert out.shape == (N, 1, H, W)
    assert jnp.allclose(out, ref, atol=1e-5, rtol=1e-5)

    print("KERNEL_OK")
</pallas_src>

<mosaic_0001>
module attributes {stable_mosaic.version = 11 : i64} {
  func.func @_sse_kernel_small_c(%arg0: i32, %arg1: i32, %arg2: memref<1x4x256xf32, #tpu.memory_space<vmem>>, %arg3: memref<4xf32, #tpu.memory_space<smem>>, %arg4: memref<1xf32, #tpu.memory_space<smem>>, %arg5: memref<1x1x256xf32, #tpu.memory_space<vmem>>) attributes {dimension_semantics = [#tpu.dimension_semantics<parallel>, #tpu.dimension_semantics<parallel>], iteration_bounds = array<i64: 2, 1>, scalar_prefetch = 0 : i64, scratch_operands = 0 : i64, tpu.core_type = #tpu.core_type<tc>, window_params = [{transform_indices = @transform_0, window_bounds = array<i64: 1, 4, 256>}, {transform_indices = @transform_1, window_bounds = array<i64: 4>}, {transform_indices = @transform_2, window_bounds = array<i64: 1>}, {transform_indices = @transform_3, window_bounds = array<i64: 1, 1, 256>}]} {
    %c0 = arith.constant 0 : index
    %c0_0 = arith.constant 0 : index
    %c0_1 = arith.constant 0 : index
    %0 = vector.load %arg2[%c0, %c0_0, %c0_1] : memref<1x4x256xf32, #tpu.memory_space<vmem>>, vector<1x4x256xf32>
    %1 = vector.shape_cast %0 : vector<1x4x256xf32> to vector<4x256xf32>
    %c0_2 = arith.constant 0 : index
    %2 = memref.load %arg4[%c0_2] : memref<1xf32, #tpu.memory_space<smem>>
    %3 = vector.broadcast %2 : f32 to vector<1x256xf32>
    %c0_3 = arith.constant 0 : index
    %4 = memref.load %arg3[%c0_3] : memref<4xf32, #tpu.memory_space<smem>>
    %5 = vector.extract_strided_slice %1 {offsets = [0, 0], sizes = [1, 256], strides = [1, 1]} : vector<4x256xf32> to vector<1x256xf32>
    %6 = vector.broadcast %4 : f32 to vector<1x256xf32>
    %7 = arith.mulf %6, %5 : vector<1x256xf32>
    %8 = arith.addf %3, %7 : vector<1x256xf32>
    %c1 = arith.constant 1 : index
    %9 = memref.load %arg3[%c1] : memref<4xf32, #tpu.memory_space<smem>>
    %10 = vector.extract_strided_slice %1 {offsets = [1, 0], sizes = [1, 256], strides = [1, 1]} : vector<4x256xf32> to vector<1x256xf32>
    %11 = vector.broadcast %9 : f32 to vector<1x256xf32>
    %12 = arith.mulf %11, %10 : vector<1x256xf32>
    %13 = arith.addf %8, %12 : vector<1x256xf32>
    %c2 = arith.constant 2 : index
    %14 = memref.load %arg3[%c2] : memref<4xf32, #tpu.memory_space<smem>>
    %15 = vector.extract_strided_slice %1 {offsets = [2, 0], sizes = [1, 256], strides = [1, 1]} : vector<4x256xf32> to vector<1x256xf32>
    %16 = vector.broadcast %14 : f32 to vector<1x256xf32>
    %17 = arith.mulf %16, %15 : vector<1x256xf32>
    %18 = arith.addf %13, %17 : vector<1x256xf32>
    %c3 = arith.constant 3 : index
    %19 = memref.load %arg3[%c3] : memref<4xf32, #tpu.memory_space<smem>>
    %20 = vector.extract_strided_slice %1 {offsets = [3, 0], sizes = [1, 256], strides = [1, 1]} : vector<4x256xf32> to vector<1x256xf32>
    %21 = vector.broadcast %19 : f32 to vector<1x256xf32>
    %22 = arith.mulf %21, %20 : vector<1x256xf32>
    %23 = arith.addf %18, %22 : vector<1x256xf32>
    %24 = arith.negf %23 : vector<1x256xf32>
    %25 = math.exp %24 : vector<1x256xf32>
    %cst = arith.constant 1.000000e+00 : f32
    %26 = vector.broadcast %cst : f32 to vector<1x256xf32>
    %27 = arith.addf %26, %25 : vector<1x256xf32>
    %28 = arith.divf %26, %27 : vector<1x256xf32>
    %c0_4 = arith.constant 0 : index
    %c0_5 = arith.constant 0 : index
    %c0_6 = arith.constant 0 : index
    %29 = vector.load %arg5[%c0_4, %c0_5, %c0_6] : memref<1x1x256xf32, #tpu.memory_space<vmem>>, vector<1x1x256xf32>
    %30 = vector.shape_cast %29 : vector<1x1x256xf32> to vector<1x256xf32>
    %31 = vector.shape_cast %28 : vector<1x256xf32> to vector<1x1x256xf32>
    tpu.vector_store %arg5[%c0_4, %c0_5, %c0_6], %31 {strides = array<i32>} : memref<1x1x256xf32, #tpu.memory_space<vmem>>, vector<1x1x256xf32>,
    return
  }
  func.func @transform_0(%arg0: i32, %arg1: i32) -> (i32, i32, i32) {
    %c0_i32 = arith.constant 0 : i32
    %c0_i32_0 = arith.constant 0 : i32
    return %arg0, %c0_i32, %arg1 : i32, i32, i32
  }
  func.func @transform_1(%arg0: i32, %arg1: i32) -> i32 {
    %c0_i32 = arith.constant 0 : i32
    %c0_i32_0 = arith.constant 0 : i32
    return %c0_i32 : i32
  }
  func.func @transform_2(%arg0: i32, %arg1: i32) -> i32 {
    %c0_i32 = arith.constant 0 : i32
    %c0_i32_0 = arith.constant 0 : i32
    return %c0_i32 : i32
  }
  func.func @transform_3(%arg0: i32, %arg1: i32) -> (i32, i32, i32) {
    %c0_i32 = arith.constant 0 : i32
    %c0_i32_0 = arith.constant 0 : i32
    return %arg0, %c0_i32, %arg1 : i32, i32, i32
  }
}

</mosaic_0001>

<bundles_post_ra>
// kernel: tpu_custom_call.1
= control target key start
LH: loop header
LB: loop body
LE: loop exit
PB: predicated region body
PF: predicated region fallthrough
CT: control target
= control target key end

     0   :  { %s857_s0 = inlined_call_operand.hbm [shape: f32[2,4,256], index: 0, kind: input, shape index: {}]   ;;  %s858_s1 = inlined_call_operand.vmem [shape: f32[4], index: 1, kind: input, shape index: {}]   ;;  %s859_s2 = inlined_call_operand.<no memory space> [shape: f32[1], index: 2, kind: input, shape index: {}]   ;;  %s860_s3 = inlined_call_operand.hbm [shape: f32[2,1,256], index: 3, kind: output, shape index: {}]  }
   0x1   :  { %8 = sst [smem:[#allocation2]] %s859_s2 }
   0x2   :  { %9 = vsyncpa [#allocation4], 0 }
   0x3   :  { %11 = vsyncpa [#allocation4 + $0x1], 0 }
   0x4   :  { %12 = vsyncpa [#allocation6], 0 }
   0x5   :  { %13 = vsyncpa [#allocation5], 0 }
   0x6   :  { %15 = vsyncpa [#allocation5 + $0x1], 0  ;;  %s657_s14 = smov 0   ;;  %s659_s15 = smov 0  }
   0x7   :  { %s661_s16 = smov 0   ;;  %s663_s17 = smov 0  }
   0x8   :  { %s665_s18 = smov 0   ;;  %s667_s19 = smov 0  }
   0x9 LB: > { %s393_s2 = sadd.s32 4294967295, %s628_s19   ;;  %s394_s20 = sadd.s32 4294967294, %s628_s19   ;;  %s628_s19 = sphi %s667_s19, %s21_s19   ;;  %s624_s18 = sphi %s665_s18, %s882_s18   ;;  %s620_s17 = sphi %s663_s17, %s881_s17   ;;  %s616_s16 = sphi %s661_s16, %s880_s16   ;;  %s612_s15 = sphi %s659_s15, %s879_s15   ;;  %s608_s14 = sphi %s657_s14, %s878_s14  }
   0xa   : > { %p55_p0 = scmp.ne.s32.totalorder %s612_s15, %s608_s14  ;;  %p691_p1 = scmp.eq.s32.totalorder %s393_s2, 0 }
   0xb   : > { %p695_p2 = scmp.eq.s32.totalorder %s393_s2, 1  ;;  %p129_p3 = scmp.eq.s32.totalorder %s394_s20, 1 }
   0xc   : > { %s865_s21 = scalar_select %p691_p1, 1, 0 }
   0xd   : > { %p701_p4 = por %p691_p1, %p55_p0  ;;  %p395_p5 = scmp.ge.s32.totalorder %s628_s19, 1 }
   0xe   : > { %p706_p6 = por %p129_p3, %p55_p0  ;;  %p136_p7 = scmp.lt.s32.totalorder %s628_s19, 3 }
   0xf   : > { %s867_s23 = scalar_select %p701_p4, 1, 0 }
  0x10   : > { %s868_s24 = scalar_select %p706_p6, 1, 0 }
  0x11   : > { %s149_s27 = sshll.u32 %s858_s1, 4  ;;  %p714_p8 = pnand %p395_p5, %p136_p7  ;;  %s150_s27 = int_to_ptr.vmem [resolvable:$true] %s149_s27 }
  0x12   : > { %s33_s30 = sadd.s32 1, %s624_s18  ;;  %s42_s4 = sadd.s32 1, %s616_s16 }
  0x13   : > { %p427_p10 = pneg %p714_p8  ;;  %p35_p12 = scmp.ge.s32.totalorder %s33_s30, 2 }
  0x14   : > { %s497_s5 = scalar_lea.vmem %s150_s27, 16  ;;  %p505_p7 = scmp.lt.s32.totalorder %s150_s27, %s150_s27 }
  0x15   : > { %p723_p11 = pnand %p427_p10, %p691_p1  ;;  %p498_p13 = scmp.ne.s32.totalorder %s150_s27, %s497_s5 }
  0x16   : > { %p506_p6 = scmp.lt.s32.totalorder %s497_s5, %s497_s5 }
  0x17   : > { %p499_p0 = pneg %p723_p11 }
  0x18   : > { %p507_p9 = por %p506_p6, %p505_p7 }
  0x19   : > { %p500_p3 = pnand %p499_p0, %p498_p13 }
  0x1b   : > { %p501_p5 = pneg %p500_p3 }
  0x1d   : > { %p508_p4 = pnand %p507_p9, %p501_p5 }
  0x1f   : > { %511 = shalt.err (!%p508_p4)
}
  0x20   : > { %s630_s6 = smov [#allocation7]   ;;  %s884_s30 = smov (%p35_p12, %s33_s30), 0 }
  0x21   : > { %430 = dma.vmem_to_smem (!%p723_p11), %s150_s27, 16, %s630_s6, [#allocation6]  }
  0x22   : > { %p49_p10 = scmp.ne.s32.totalorder %s616_s16, %s612_s15  ;;  %p50_p6 = scmp.eq.s32.totalorder %s628_s19, 0 }
  0x23   : > { %s37_s7 = ssub.s32 %s624_s18, %s884_s30  ;;  %p440_p4 = scmp.lt.s32.totalorder %s628_s19, 2 }
  0x24   : > { %p40_p9 = scmp.eq.s32.totalorder %s37_s7, 0  ;;  %p51_p13 = por %p50_p6, %p49_p10 }
  0x25   : > { %p743_p0 = por %p695_p2, %p49_p10  ;;  %s163_s9 = sand.u32 1, %s616_s16  }
  0x26   : > { %s749_s10 = scalar_select %p40_p9, %s616_s16, %s42_s4  }
  0x27   : > { %s871_s8 = scalar_select %p743_p0, 1, 0 }
  0x28   : > { %s398_s11 = sshll.u32 %s163_s9, 3  ;;  %s417_s12 = sshll.u32 %s624_s18, 7 }
  0x29   : > { %s755_s20 = scalar_lea.hbm %s857_s0, %s417_s12  ;;  %s167_s25 = scalar_lea.vmem [#allocation3], %s398_s11 }
  0x2a   : > { %s177_s22 = sshll.u32 %s167_s25, 4  ;;  %p759_p2 = pnand %p440_p4, %p51_p13  ;;  %s757_s22 = int_to_ptr.vmem [resolvable:$true] %s177_s22 }
  0x2b   : > { %s164_s27 = scalar_lea.sflag [#allocation4], %s163_s9  ;;  %s512_s29 = scalar_lea.hbm %s755_s20, 128 }
  0x2c   : > { %p513_p11 = scmp.ne.s32.totalorder %s755_s20, %s512_s29  ;;  %p514_p12 = pneg %p759_p2 }
  0x2d   : > { %s517_s6 = scalar_lea.hbm %s857_s0, 256  ;;  %p518_p7 = scmp.lt.u32.totalorder %s755_s20, %s857_s0 }
  0x2e   : > { %p515_p3 = pnand %p514_p12, %p513_p11  ;;  %p519_p10 = scmp.lt.u32.totalorder %s517_s6, %s512_s29 }
  0x2f   : > { %p521_p4 = scmp.lt.u32.totalorder %s512_s29, %s755_s20 }
  0x30   : > { %p516_p5 = pneg %p515_p3  ;;  %p520_p6 = por %p519_p10, %p518_p7 }
  0x32   : > { %p522_p9 = por %p521_p4, %p520_p6 }
  0x34   : > { %p523_p13 = pnand %p522_p9, %p516_p5 }
  0x36   : > { %526 = shalt.err (!%p523_p13)
}
  0x37   : > { %s527_s9 = scalar_lea.vmem %s757_s22, 128  ;;  %s631_s12 = smov [#allocation3]  }
  0x38   : > { %p528_p11 = scmp.ne.s32.totalorder %s757_s22, %s527_s9  ;;  %s532_s13 = sshll.u32 %s631_s12, 4  ;;  %s533_s13 = int_to_ptr.vmem [resolvable:$false] %s532_s13 }
  0x39   : > { %s534_s2 = scalar_lea.vmem %s533_s13, 256  ;;  %p535_p1 = scmp.lt.s32.totalorder %s757_s22, %s533_s13 }
  0x3a   : > { %p530_p3 = pnand %p528_p11, %p514_p12  ;;  %p536_p7 = scmp.lt.s32.totalorder %s534_s2, %s527_s9 }
  0x3c   : > { %p531_p0 = pneg %p530_p3  ;;  %p537_p10 = por %p536_p7, %p535_p1 }
  0x3e   : > { %p538_p6 = pnand %p537_p10, %p531_p0 }
  0x40   : > { %541 = shalt.err (!%p538_p6)
}
  0x41   : > { %434 = dma.hbm_to_vmem [thread:$0]  (!%p759_p2), %s755_s20, 128, %s757_s22, %s164_s27  }
  0x42   : > { %186 = sbr.rel (%p714_p8) target bundleno = 141 (0x8d), region = 32  ;;  %s791_s25 = sand.u32 (!%p714_p8), 1, %s612_s15  }
  0x43   : > { %s402_s29 = sshll.u32 (!%p714_p8), %s791_s25, 3  ;;  %s189_s4 = scalar_lea.sflag (!%p714_p8), [#allocation4], %s791_s25 }
  0x44   : > { %s192_s5 = scalar_lea.vmem (!%p714_p8), [#allocation3], %s402_s29  ;;  %p873_p1 = scmp.ne.s32.totalorder (!%p714_p8), %s867_s23, 0 }
  0x49   : > { %595 = dma.done.wait (%p873_p1), %s189_s4, 128  }
  0x4a   : > { %597 = vsyncadd (%p873_p1), %s189_s4, 4294967168  ;;  %p874_p0 = scmp.ne.s32.totalorder %s865_s21, 0 }
  0x4c   : > { %599 = dma.done.wait (%p874_p0), [#allocation6], 16  }
  0x4d   : > { %601 = vsyncadd (%p874_p0), [#allocation6], 4294967280 }
  0x4e   : > { %201 = sfence }
  0x4f   : > { %s223_s28 = sld [smem:[#allocation2]]  ;;  %s405_s22 = sld [smem:[#allocation7 + $0x1]]  ;;  %v222_v0 = vld [vmem:[%s192_s5] sm:$0xff]  ;;  %v632_v20 = vmov 1966171168   ;;  %v263_v22 = vlaneseq }
  0x50   : > { %s225_s20 = sld [smem:[#allocation7]]  ;;  %s407_s26 = sld [smem:[#allocation7 + $0x2]]  ;;  %v261_v21 = vunpack.c.l.s4 %v632_v20 }
  0x51   : > { %s409_s27 = sld [smem:[#allocation7 + $0x3]]  ;;  %s404_s21 = sshll.u32 %s791_s25, 1  ;;  %v264_v24 = vshrl.u32 %v263_v22, 7  ;;  %vm277_vm0 = vcmp.lt.s32.totalorder %v263_v22, 256 }
  0x52   : > { %v262_v23 = vunpack.c.0.s8 %v261_v21  ;;  %s219_s23 = scalar_lea.vmem [#allocation8], %s404_s21  ;;  %s418_s7 = sshll.u32 %s620_s17, 5 }
  0x53   : > { %s297_s6 = sshll.u32 %s219_s23, 4  ;;  %s810_s12 = scalar_lea.hbm %s860_s3, %s418_s7  ;;  %s805_s6 = int_to_ptr.vmem [resolvable:$true] %s297_s6 }
  0x54   : > { %v265_v25 = vsub.s32 %v262_v23, %v264_v24  ;;  %s281_s13 = scalar_lea.sflag [#allocation5], %s791_s25  ;;  %s542_s2 = scalar_lea.vmem %s805_s6, 32 }
  0x55   : > { %v224_v1 = vstv %s223_s28  ;;  %v230_v4 = vstv %s405_s22  ;;  %p543_p8 = scmp.ne.s32.totalorder %s805_s6, %s542_s2  ;;  %p875_p2 = scmp.ne.s32.totalorder %s871_s8, 0 }
  0x56   : > { %v226_v2 = vstv %s225_s20  ;;  %v238_v5 = vstv %s407_s26  ;;  %v231_v6 = vmul.f32 %v230_v4, %v222_v0  ;;  %s633_s17 = smov [#allocation8]  }
  0x57   : > { %v227_v3 = vmul.f32 %v226_v2, %v222_v0  ;;  %v239_v7 = vmul.f32 %v238_v5, %v222_v0  ;;  %v246_v8 = vstv %s409_s27  ;;  %p544_p12 = pnand %p543_p8, %p875_p2  ;;  %s546_s29 = sshll.u32 %s633_s17, 4  ;;  %s547_s29 = int_to_ptr.vmem [resolvable:$false] %s546_s29 }
  0x58   : > { %v247_v10 = vmul.f32 %v246_v8, %v222_v0  ;;  %v406_v11 = vrot.slane %v231_v6, 9  ;;  %s548_s4 = scalar_lea.vmem %s547_s29, 64  ;;  %p549_p4 = scmp.lt.s32.totalorder %s805_s6, %s547_s29 }
  0x59   : > { %v228_v9 = vadd.f32 %v227_v3, %v224_v1  ;;  %v408_v12 = vrot.slane %v239_v7, 10  ;;  %p545_p5 = pneg %p544_p12  ;;  %p550_p9 = scmp.lt.s32.totalorder %s548_s4, %s542_s2 }
  0x5a   : > { %v410_v14 = vrot.slane %v247_v10, 11 }
  0x5b   : > { %v236_v13 = vadd.f32 %v406_v11, %v228_v9  ;;  %p551_p13 = por %p550_p9, %p549_p4 }
  0x5d   : > { %v244_v15 = vadd.f32 %v408_v12, %v236_v13  ;;  %p552_p11 = pnand %p551_p13, %p545_p5 }
  0x5f   : > { %v252_v16 = vadd.f32 %v410_v14, %v244_v15 }
  0x61   : > { %v411_v17 = vmul.f32 -1.442695, %v252_v16 }
  0x63   : > { %493 = vpow2.f32 %v411_v17 }
  0x6d   : > { %v494_v18 = vpop.eup %493 }
  0x6e   : > { %v256_v19 = vadd.f32 1.0, %v494_v18 }
  0x70   : > { %495 = vrcp.f32 %v256_v19 }
  0x7a   : > { %v496_v26 = vpop.eup %495 }
  0x7b   : > { %v266_v27 = vrot.slane %v496_v26, %v265_v25 }
  0x7d   : > { %v273_v28 = vrot.slane %v266_v27, %v265_v25 }
  0x7f   : > { %279 = vst.msk [vmem:[%s219_s23] sm:$0x3] %vm277_vm0, %v273_v28 }
  0x80   : > { %555 = shalt.err (!%p552_p11)
}
  0x81   : > { %s556_s25 = scalar_lea.hbm %s810_s12, 32  ;;  %s560_s20 = scalar_lea.hbm %s860_s3, 64 }
  0x82   : > { %p557_p3 = scmp.ne.s32.totalorder %s810_s12, %s556_s25  ;;  %p561_p6 = scmp.lt.u32.totalorder %s810_s12, %s860_s3 }
  0x83   : > { %p562_p1 = scmp.lt.u32.totalorder %s560_s20, %s556_s25  ;;  %p564_p8 = scmp.lt.u32.totalorder %s556_s25, %s810_s12 }
  0x84   : > { %p558_p7 = pnand %p557_p3, %p875_p2 }
  0x85   : > { %p563_p0 = por %p562_p1, %p561_p6 }
  0x86   : > { %p559_p10 = pneg %p558_p7 }
  0x87   : > { %p565_p12 = por %p564_p8, %p563_p0 }
  0x89   : > { %p566_p5 = pnand %p565_p12, %p559_p10 }
  0x8b   : > { %569 = shalt.err (!%p566_p5)
}
  0x8c   : > { %425 = dma.vmem_to_hbm [thread:$0]  (%p875_p2), %s805_s6, 32, %s810_s12, %s281_s13  }
  0x8d PF: > { %s309_s27 = sand.u32 1, %s608_s14   ;;  %p876_p4 = scmp.ne.s32.totalorder %s868_s24, 0 }
  0x8e   : > { %p877_p9 = scmp.ge.s32.totalorder %s628_s19, 2  ;;  %s310_s21 = scalar_lea.sflag [#allocation5], %s309_s27 }
  0x90   : > { %p436_p13 = pnand %p877_p9, %p876_p4 }
  0x92   : > { %603 = dma.done.wait (!%p436_p13), %s310_s21, 32  }
  0x93   : > { %605 = vsyncadd (!%p436_p13), %s310_s21, 4294967264  ;;  %s21_s19 = sadd.s32 1, %s628_s19   ;;  %s878_s14 = smov %s612_s15 }
  0x94   : > { %p18_p11 = scmp.ge.s32.totalorder %s21_s19, 4   ;;  %s879_s15 = smov %s616_s16 }
  0x95   : > { %s880_s16 = smov %s749_s10  ;;  %s881_s17 = smov %s624_s18 }
  0x96   : > { %s882_s18 = smov %s884_s30  ;;  %20 = sbr.rel (!%p18_p11) target bundleno = 9 (0x9), region = 82 }
  0x9d   :  { %315 = vsyncpa [#allocation4], 1 }
  0x9e   :  { %317 = vsyncpa [#allocation4 + $0x1], 1 }
  0x9f   :  { %318 = vsyncpa [#allocation5], 1 }
  0xa0   :  { %320 = vsyncpa [#allocation5 + $0x1], 1 }
  0xa1   :  { %321 = vsyncpa [#allocation6], 1 }
  0xa2   :  { %323 = vsyncpa [#allocation6 + $0x1], 1 }

</bundles_post_ra>
